<compile_context>
chip_gen: v7x
topology: tpu7x:2x2x1
jax: 0.10.0
libtpu: 0.0.40
codegen_flags: <defaults>
</compile_context>

<pallas_src>
import math

import jax
import jax.numpy as jnp
from jax.experimental import pallas as pl
from jax.experimental.pallas import tpu as pltpu


def tcn_kernel(x_ref, w_ref, b_ref, o_ref, acc_ref):
    """One lane tile of the fused BN+Conv(1,K)+ReLU.

    x_ref  : (C_in, TILE)      input positions (channels on sublanes, positions on lanes)
    w_ref  : (K, C_out, C_in)  BN-folded conv taps
    b_ref  : (C_out, 1)        BN-folded bias (float32)
    o_ref  : (C_out, TILE)     output positions
    acc_ref: (C_out, TILE)     float32 accumulator scratch
    """
    tile = x_ref.shape[1]
    k_taps = w_ref.shape[0]

    # Tap k = 0 initializes the accumulator at full width (MXU, f32 accumulate).
    acc_ref[...] = jnp.dot(w_ref[0], x_ref[...],
                           preferred_element_type=jnp.float32)

    # Remaining taps: shifted slices.  The last k columns of the tile miss these
    # terms, but they map to output positions with w >= W_out which the wrapper
    # discards, so no halo is required.
    for k in range(1, k_taps):          # k_taps is small & static -> unrolled
        width = tile - k
        part = jnp.dot(w_ref[k], x_ref[:, pl.ds(k, width)],
                       preferred_element_type=jnp.float32)
        acc_ref[:, pl.ds(0, width)] = acc_ref[:, pl.ds(0, width)] + part

    out = jnp.maximum(acc_ref[...] + b_ref[...], 0.0)
    o_ref[...] = out.astype(o_ref.dtype)


def tcn_forward(x, conv_w, conv_b, bn_gamma, bn_beta, bn_mean, bn_var,
                eps=1e-5, rows_per_tile=None):
    """Pallas TCN forward (eval mode). x: (B, C_in, H, W) -> (B, C_out, H, W-K+1)."""
    B, C_in, H, W = x.shape
    C_out, C_in_w, KH, KW = conv_w.shape
    assert C_in_w == C_in and KH == 1, "kernel_size must be (1, K)"
    assert bn_gamma.shape == (C_in,), "BatchNorm acts on the input channels"
    K = KW
    assert W >= K, "frame axis must be at least the kernel width"
    W_out = W - K + 1

    # ---- fold eval-mode BatchNorm (per-channel affine) into the conv ----
    scale = (bn_gamma.astype(jnp.float32)
             / jnp.sqrt(bn_var.astype(jnp.float32) + eps))
    shift = bn_beta.astype(jnp.float32) - bn_mean.astype(jnp.float32) * scale
    w3 = conv_w[:, :, 0, :].astype(jnp.float32)                    # (C_out, C_in, K)
    w_folded = w3 * scale[None, :, None]
    b_folded = conv_b.astype(jnp.float32) + jnp.einsum('oik,i->o', w3, shift)
    w_taps = jnp.transpose(w_folded, (2, 0, 1)).astype(x.dtype)    # (K, C_out, C_in)
    b_col = b_folded.reshape(C_out, 1)                             # (C_out, 1) f32

    # ---- channels-first flat layout: (C_in, B*H*W), positions on lanes ----
    R = B * H
    xf = jnp.transpose(x, (1, 0, 2, 3)).reshape(C_in, R * W)

    # rows (b,h) per tile: lane width = g*W must be a multiple of 128; target ~512.
    if rows_per_tile is None:
        base = 128 // math.gcd(W, 128)
        g = base * max(1, 512 // (base * W))
    else:
        g = rows_per_tile
    r_pad = pl.cdiv(R, g) * g
    if r_pad != R:
        xf = jnp.pad(xf, ((0, 0), (0, (r_pad - R) * W)))
    tile = g * W
    grid = (r_pad // g,)

    itemsize = x.dtype.itemsize
    cost = pl.CostEstimate(
        flops=2 * K * C_in * C_out * r_pad * W,
        transcendentals=0,
        bytes_accessed=(C_in + C_out) * r_pad * W * itemsize
        + int(w_taps.size) * itemsize + int(b_col.size) * 4,
    )

    out_flat = pl.pallas_call(
        tcn_kernel,
        out_shape=jax.ShapeDtypeStruct((C_out, r_pad * W), x.dtype),
        grid_spec=pltpu.PrefetchScalarGridSpec(
            num_scalar_prefetch=0,
            grid=grid,
            in_specs=[
                pl.BlockSpec((C_in, tile), lambda i: (0, i)),
                pl.BlockSpec((K, C_out, C_in), lambda i: (0, 0, 0)),
                pl.BlockSpec((C_out, 1), lambda i: (0, 0)),
            ],
            out_specs=pl.BlockSpec((C_out, tile), lambda i: (0, i)),
            scratch_shapes=[pltpu.VMEM((C_out, tile), jnp.float32)],
        ),
        compiler_params=pltpu.CompilerParams(
            dimension_semantics=("parallel",),
            vmem_limit_bytes=32 * 1024 * 1024,
        ),
        cost_estimate=cost,
    )(xf, w_taps, b_col)

    # drop padded rows and the invalid (w >= W_out) columns, restore NCHW layout
    out = out_flat.reshape(C_out, r_pad, W)[:, :R, :W_out]
    out = out.reshape(C_out, B, H, W_out).transpose(1, 0, 2, 3)
    return out


def tcn_reference(x, conv_w, conv_b, bn_gamma, bn_beta, bn_mean, bn_var, eps=1e-5):
    """Pure-JAX reference replicating the PyTorch eval-mode forward."""
    scale = bn_gamma / jnp.sqrt(bn_var + eps)
    shift = bn_beta - bn_mean * scale
    xb = x * scale[None, :, None, None] + shift[None, :, None, None]
    y = jax.lax.conv_general_dilated(
        xb, conv_w, window_strides=(1, 1), padding='VALID',
        dimension_numbers=('NCHW', 'OIHW', 'NCHW'),
        precision=jax.lax.Precision.HIGHEST)
    y = y + conv_b[None, :, None, None]
    return jnp.maximum(y, 0.0)          # dropout(p=0 / eval) = identity


def init_tcn_params(key, in_channels, out_channels, kernel_w=7, dtype=jnp.float32):
    """kaiming_uniform conv weight, zero bias, non-trivial eval-mode BN stats."""
    kw, kg, kb, km, kv = jax.random.split(key, 5)
    fan_in = in_channels * 1 * kernel_w
    bound = math.sqrt(2.0) * math.sqrt(3.0 / fan_in)
    conv_w = jax.random.uniform(kw, (out_channels, in_channels, 1, kernel_w),
                                dtype, -bound, bound)
    conv_b = jnp.zeros((out_channels,), dtype)           # nn.init.constant_(bias, 0)
    bn_gamma = jax.random.uniform(kg, (in_channels,), dtype, 0.5, 1.5)
    bn_beta = 0.1 * jax.random.normal(kb, (in_channels,), dtype)
    bn_mean = 0.5 * jax.random.normal(km, (in_channels,), dtype)
    bn_var = jax.random.uniform(kv, (in_channels,), dtype, 0.5, 1.5)
    return conv_w, conv_b, bn_gamma, bn_beta, bn_mean, bn_var


if __name__ == "__main__":
    key = jax.random.PRNGKey(0)
    kx, kp, kx2 = jax.random.split(key, 3)

    # Case 1: batch=2, channels=4 (in==out, as the module's BatchNorm requires),
    #         spatial H=16, frames W=32, kernel (1, 7).
    B, C, H, W = 2, 4, 16, 32
    x = jax.random.normal(kx, (B, C, H, W), jnp.float32)
    params = init_tcn_params(kp, C, C, kernel_w=7)

    out = jax.block_until_ready(tcn_forward(x, *params))
    ref = tcn_reference(x, *params)
    assert out.shape == (B, C, H, W - 7 + 1)
    assert jnp.allclose(out, ref, atol=1e-3, rtol=1e-3), \
        f"mismatch vs reference: {float(jnp.max(jnp.abs(out - ref)))}"

    # Case 2: exercises row padding (B*H not a multiple of the row tile) and a
    #         frame count that does not divide 128.
    B2, H2, W2 = 3, 5, 40
    x2 = jax.random.normal(kx2, (B2, C, H2, W2), jnp.float32)
    out2 = jax.block_until_ready(tcn_forward(x2, *params))
    ref2 = tcn_reference(x2, *params)
    assert out2.shape == (B2, C, H2, W2 - 7 + 1)
    assert jnp.allclose(out2, ref2, atol=1e-3, rtol=1e-3), \
        f"mismatch vs reference (case 2): {float(jnp.max(jnp.abs(out2 - ref2)))}"

    print("KERNEL_OK")
</pallas_src>

<mosaic_0001>
module attributes {stable_mosaic.version = 11 : i64} {
  func.func @tcn_kernel(%arg0: i32, %arg1: memref<4x512xf32, #tpu.memory_space<vmem>>, %arg2: memref<7x4x4xf32, #tpu.memory_space<vmem>>, %arg3: memref<4x1xf32, #tpu.memory_space<vmem>>, %arg4: memref<4x512xf32, #tpu.memory_space<vmem>>, %arg5: memref<4x512xf32, #tpu.memory_space<vmem>>) attributes {dimension_semantics = [#tpu.dimension_semantics<parallel>], iteration_bounds = array<i64: 2>, scalar_prefetch = 0 : i64, scratch_operands = 1 : i64, tpu.core_type = #tpu.core_type<tc>, window_params = [{transform_indices = @transform_0, window_bounds = array<i64: 4, 512>}, {pipeline_mode = #tpu.pipeline_mode<synchronous>, transform_indices = @transform_1, window_bounds = array<i64: 7, 4, 4>}, {pipeline_mode = #tpu.pipeline_mode<synchronous>, transform_indices = @transform_2, window_bounds = array<i64: 4, 1>}, {transform_indices = @transform_3, window_bounds = array<i64: 4, 512>}]} {
    %c0 = arith.constant 0 : index
    %c0_0 = arith.constant 0 : index
    %c0_1 = arith.constant 0 : index
    %0 = vector.load %arg2[%c0, %c0_0, %c0_1] : memref<7x4x4xf32, #tpu.memory_space<vmem>>, vector<1x4x4xf32>
    %1 = vector.shape_cast %0 : vector<1x4x4xf32> to vector<4x4xf32>
    %c0_2 = arith.constant 0 : index
    %c0_3 = arith.constant 0 : index
    %2 = vector.load %arg1[%c0_2, %c0_3] : memref<4x512xf32, #tpu.memory_space<vmem>>, vector<4x512xf32>
    %cst = arith.constant dense<0.000000e+00> : vector<4x512xf32>
    %3 = tpu.matmul %1, %2, %cst {dimension_numbers = #tpu.dot_dimension_numbers<[1], [0], [0], [1], [0, 0, 1, 1], [], []>} : vector<4x4xf32>, vector<4x512xf32>, vector<4x512xf32> -> vector<4x512xf32>
    %c0_4 = arith.constant 0 : index
    %c0_5 = arith.constant 0 : index
    %4 = vector.load %arg5[%c0_4, %c0_5] : memref<4x512xf32, #tpu.memory_space<vmem>>, vector<4x512xf32>
    tpu.vector_store %arg5[%c0_4, %c0_5], %3 {strides = array<i32>} : memref<4x512xf32, #tpu.memory_space<vmem>>, vector<4x512xf32>,
    %c1 = arith.constant 1 : index
    %c0_6 = arith.constant 0 : index
    %c0_7 = arith.constant 0 : index
    %5 = vector.load %arg2[%c1, %c0_6, %c0_7] : memref<7x4x4xf32, #tpu.memory_space<vmem>>, vector<1x4x4xf32>
    %6 = vector.shape_cast %5 : vector<1x4x4xf32> to vector<4x4xf32>
    %c0_8 = arith.constant 0 : index
    %c1_9 = arith.constant 1 : index
    %7 = vector.load %arg1[%c0_8, %c1_9] : memref<4x512xf32, #tpu.memory_space<vmem>>, vector<4x511xf32>
    %cst_10 = arith.constant dense<0.000000e+00> : vector<4x511xf32>
    %8 = tpu.matmul %6, %7, %cst_10 {dimension_numbers = #tpu.dot_dimension_numbers<[1], [0], [0], [1], [0, 0, 1, 1], [], []>} : vector<4x4xf32>, vector<4x511xf32>, vector<4x511xf32> -> vector<4x511xf32>
    %c0_11 = arith.constant 0 : index
    %c0_12 = arith.constant 0 : index
    %9 = vector.load %arg5[%c0_11, %c0_12] : memref<4x512xf32, #tpu.memory_space<vmem>>, vector<4x511xf32>
    %10 = arith.addf %9, %8 : vector<4x511xf32>
    %c0_13 = arith.constant 0 : index
    %c0_14 = arith.constant 0 : index
    %11 = vector.load %arg5[%c0_13, %c0_14] : memref<4x512xf32, #tpu.memory_space<vmem>>, vector<4x511xf32>
    tpu.vector_store %arg5[%c0_13, %c0_14], %10 {strides = array<i32>} : memref<4x512xf32, #tpu.memory_space<vmem>>, vector<4x511xf32>,
    %c2 = arith.constant 2 : index
    %c0_15 = arith.constant 0 : index
    %c0_16 = arith.constant 0 : index
    %12 = vector.load %arg2[%c2, %c0_15, %c0_16] : memref<7x4x4xf32, #tpu.memory_space<vmem>>, vector<1x4x4xf32>
    %13 = vector.shape_cast %12 : vector<1x4x4xf32> to vector<4x4xf32>
    %c0_17 = arith.constant 0 : index
    %c2_18 = arith.constant 2 : index
    %14 = vector.load %arg1[%c0_17, %c2_18] : memref<4x512xf32, #tpu.memory_space<vmem>>, vector<4x510xf32>
    %cst_19 = arith.constant dense<0.000000e+00> : vector<4x510xf32>
    %15 = tpu.matmul %13, %14, %cst_19 {dimension_numbers = #tpu.dot_dimension_numbers<[1], [0], [0], [1], [0, 0, 1, 1], [], []>} : vector<4x4xf32>, vector<4x510xf32>, vector<4x510xf32> -> vector<4x510xf32>
    %c0_20 = arith.constant 0 : index
    %c0_21 = arith.constant 0 : index
    %16 = vector.load %arg5[%c0_20, %c0_21] : memref<4x512xf32, #tpu.memory_space<vmem>>, vector<4x510xf32>
    %17 = arith.addf %16, %15 : vector<4x510xf32>
    %c0_22 = arith.constant 0 : index
    %c0_23 = arith.constant 0 : index
    %18 = vector.load %arg5[%c0_22, %c0_23] : memref<4x512xf32, #tpu.memory_space<vmem>>, vector<4x510xf32>
    tpu.vector_store %arg5[%c0_22, %c0_23], %17 {strides = array<i32>} : memref<4x512xf32, #tpu.memory_space<vmem>>, vector<4x510xf32>,
    %c3 = arith.constant 3 : index
    %c0_24 = arith.constant 0 : index
    %c0_25 = arith.constant 0 : index
    %19 = vector.load %arg2[%c3, %c0_24, %c0_25] : memref<7x4x4xf32, #tpu.memory_space<vmem>>, vector<1x4x4xf32>
    %20 = vector.shape_cast %19 : vector<1x4x4xf32> to vector<4x4xf32>
    %c0_26 = arith.constant 0 : index
    %c3_27 = arith.constant 3 : index
    %21 = vector.load %arg1[%c0_26, %c3_27] : memref<4x512xf32, #tpu.memory_space<vmem>>, vector<4x509xf32>
    %cst_28 = arith.constant dense<0.000000e+00> : vector<4x509xf32>
    %22 = tpu.matmul %20, %21, %cst_28 {dimension_numbers = #tpu.dot_dimension_numbers<[1], [0], [0], [1], [0, 0, 1, 1], [], []>} : vector<4x4xf32>, vector<4x509xf32>, vector<4x509xf32> -> vector<4x509xf32>
    %c0_29 = arith.constant 0 : index
    %c0_30 = arith.constant 0 : index
    %23 = vector.load %arg5[%c0_29, %c0_30] : memref<4x512xf32, #tpu.memory_space<vmem>>, vector<4x509xf32>
    %24 = arith.addf %23, %22 : vector<4x509xf32>
    %c0_31 = arith.constant 0 : index
    %c0_32 = arith.constant 0 : index
    %25 = vector.load %arg5[%c0_31, %c0_32] : memref<4x512xf32, #tpu.memory_space<vmem>>, vector<4x509xf32>
    tpu.vector_store %arg5[%c0_31, %c0_32], %24 {strides = array<i32>} : memref<4x512xf32, #tpu.memory_space<vmem>>, vector<4x509xf32>,
    %c4 = arith.constant 4 : index
    %c0_33 = arith.constant 0 : index
    %c0_34 = arith.constant 0 : index
    %26 = vector.load %arg2[%c4, %c0_33, %c0_34] : memref<7x4x4xf32, #tpu.memory_space<vmem>>, vector<1x4x4xf32>
    %27 = vector.shape_cast %26 : vector<1x4x4xf32> to vector<4x4xf32>
    %c0_35 = arith.constant 0 : index
    %c4_36 = arith.constant 4 : index
    %28 = vector.load %arg1[%c0_35, %c4_36] : memref<4x512xf32, #tpu.memory_space<vmem>>, vector<4x508xf32>
    %cst_37 = arith.constant dense<0.000000e+00> : vector<4x508xf32>
    %29 = tpu.matmul %27, %28, %cst_37 {dimension_numbers = #tpu.dot_dimension_numbers<[1], [0], [0], [1], [0, 0, 1, 1], [], []>} : vector<4x4xf32>, vector<4x508xf32>, vector<4x508xf32> -> vector<4x508xf32>
    %c0_38 = arith.constant 0 : index
    %c0_39 = arith.constant 0 : index
    %30 = vector.load %arg5[%c0_38, %c0_39] : memref<4x512xf32, #tpu.memory_space<vmem>>, vector<4x508xf32>
    %31 = arith.addf %30, %29 : vector<4x508xf32>
    %c0_40 = arith.constant 0 : index
    %c0_41 = arith.constant 0 : index
    %32 = vector.load %arg5[%c0_40, %c0_41] : memref<4x512xf32, #tpu.memory_space<vmem>>, vector<4x508xf32>
    tpu.vector_store %arg5[%c0_40, %c0_41], %31 {strides = array<i32>} : memref<4x512xf32, #tpu.memory_space<vmem>>, vector<4x508xf32>,
    %c5 = arith.constant 5 : index
    %c0_42 = arith.constant 0 : index
    %c0_43 = arith.constant 0 : index
    %33 = vector.load %arg2[%c5, %c0_42, %c0_43] : memref<7x4x4xf32, #tpu.memory_space<vmem>>, vector<1x4x4xf32>
    %34 = vector.shape_cast %33 : vector<1x4x4xf32> to vector<4x4xf32>
    %c0_44 = arith.constant 0 : index
    %c5_45 = arith.constant 5 : index
    %35 = vector.load %arg1[%c0_44, %c5_45] : memref<4x512xf32, #tpu.memory_space<vmem>>, vector<4x507xf32>
    %cst_46 = arith.constant dense<0.000000e+00> : vector<4x507xf32>
    %36 = tpu.matmul %34, %35, %cst_46 {dimension_numbers = #tpu.dot_dimension_numbers<[1], [0], [0], [1], [0, 0, 1, 1], [], []>} : vector<4x4xf32>, vector<4x507xf32>, vector<4x507xf32> -> vector<4x507xf32>
    %c0_47 = arith.constant 0 : index
    %c0_48 = arith.constant 0 : index
    %37 = vector.load %arg5[%c0_47, %c0_48] : memref<4x512xf32, #tpu.memory_space<vmem>>, vector<4x507xf32>
    %38 = arith.addf %37, %36 : vector<4x507xf32>
    %c0_49 = arith.constant 0 : index
    %c0_50 = arith.constant 0 : index
    %39 = vector.load %arg5[%c0_49, %c0_50] : memref<4x512xf32, #tpu.memory_space<vmem>>, vector<4x507xf32>
    tpu.vector_store %arg5[%c0_49, %c0_50], %38 {strides = array<i32>} : memref<4x512xf32, #tpu.memory_space<vmem>>, vector<4x507xf32>,
    %c6 = arith.constant 6 : index
    %c0_51 = arith.constant 0 : index
    %c0_52 = arith.constant 0 : index
    %40 = vector.load %arg2[%c6, %c0_51, %c0_52] : memref<7x4x4xf32, #tpu.memory_space<vmem>>, vector<1x4x4xf32>
    %41 = vector.shape_cast %40 : vector<1x4x4xf32> to vector<4x4xf32>
    %c0_53 = arith.constant 0 : index
    %c6_54 = arith.constant 6 : index
    %42 = vector.load %arg1[%c0_53, %c6_54] : memref<4x512xf32, #tpu.memory_space<vmem>>, vector<4x506xf32>
    %cst_55 = arith.constant dense<0.000000e+00> : vector<4x506xf32>
    %43 = tpu.matmul %41, %42, %cst_55 {dimension_numbers = #tpu.dot_dimension_numbers<[1], [0], [0], [1], [0, 0, 1, 1], [], []>} : vector<4x4xf32>, vector<4x506xf32>, vector<4x506xf32> -> vector<4x506xf32>
    %c0_56 = arith.constant 0 : index
    %c0_57 = arith.constant 0 : index
    %44 = vector.load %arg5[%c0_56, %c0_57] : memref<4x512xf32, #tpu.memory_space<vmem>>, vector<4x506xf32>
    %45 = arith.addf %44, %43 : vector<4x506xf32>
    %c0_58 = arith.constant 0 : index
    %c0_59 = arith.constant 0 : index
    %46 = vector.load %arg5[%c0_58, %c0_59] : memref<4x512xf32, #tpu.memory_space<vmem>>, vector<4x506xf32>
    tpu.vector_store %arg5[%c0_58, %c0_59], %45 {strides = array<i32>} : memref<4x512xf32, #tpu.memory_space<vmem>>, vector<4x506xf32>,
    %c0_60 = arith.constant 0 : index
    %c0_61 = arith.constant 0 : index
    %47 = vector.load %arg5[%c0_60, %c0_61] : memref<4x512xf32, #tpu.memory_space<vmem>>, vector<4x512xf32>
    %c0_62 = arith.constant 0 : index
    %c0_63 = arith.constant 0 : index
    %48 = vector.load %arg3[%c0_62, %c0_63] : memref<4x1xf32, #tpu.memory_space<vmem>>, vector<4x1xf32>
    %49 = vector.broadcast %48 : vector<4x1xf32> to vector<4x512xf32>
    %50 = arith.addf %47, %49 : vector<4x512xf32>
    %cst_64 = arith.constant 0.000000e+00 : f32
    %51 = vector.broadcast %cst_64 : f32 to vector<4x512xf32>
    %52 = arith.maximumf %50, %51 : vector<4x512xf32>
    %c0_65 = arith.constant 0 : index
    %c0_66 = arith.constant 0 : index
    %53 = vector.load %arg4[%c0_65, %c0_66] : memref<4x512xf32, #tpu.memory_space<vmem>>, vector<4x512xf32>
    tpu.vector_store %arg4[%c0_65, %c0_66], %52 {strides = array<i32>} : memref<4x512xf32, #tpu.memory_space<vmem>>, vector<4x512xf32>,
    return
  }
  func.func @transform_0(%arg0: i32) -> (i32, i32) {
    %c0_i32 = arith.constant 0 : i32
    %c0_i32_0 = arith.constant 0 : i32
    return %c0_i32, %arg0 : i32, i32
  }
  func.func @transform_1(%arg0: i32) -> (i32, i32, i32) {
    %c0_i32 = arith.constant 0 : i32
    %c0_i32_0 = arith.constant 0 : i32
    %c0_i32_1 = arith.constant 0 : i32
    %c0_i32_2 = arith.constant 0 : i32
    return %c0_i32, %c0_i32_0, %c0_i32_1 : i32, i32, i32
  }
  func.func @transform_2(%arg0: i32) -> (i32, i32) {
    %c0_i32 = arith.constant 0 : i32
    %c0_i32_0 = arith.constant 0 : i32
    %c0_i32_1 = arith.constant 0 : i32
    return %c0_i32, %c0_i32_0 : i32, i32
  }
  func.func @transform_3(%arg0: i32) -> (i32, i32) {
    %c0_i32 = arith.constant 0 : i32
    %c0_i32_0 = arith.constant 0 : i32
    return %c0_i32, %arg0 : i32, i32
  }
}

</mosaic_0001>

<bundles_post_ra>
// kernel: tpu_custom_call.1
= control target key start
LH: loop header
LB: loop body
LE: loop exit
PB: predicated region body
PF: predicated region fallthrough
CT: control target
= control target key end

     0   :  { %8 = vsyncpa [#allocation4], 0  ;;  %s1964_s0 = inlined_call_operand.vmem [shape: f32[4,1024], index: 0, kind: input, shape index: {}]   ;;  %s1965_s1 = inlined_call_operand.vmem [shape: f32[7,4,4], index: 1, kind: input, shape index: {}]   ;;  %s1966_s2 = inlined_call_operand.vmem [shape: f32[4,1], index: 2, kind: input, shape index: {}]   ;;  %s1967_s3 = inlined_call_operand.hbm [shape: f32[4,1024], index: 3, kind: output, shape index: {}]  }
   0x1   :  { %10 = vsyncpa [#allocation4 + $0x1], 0  ;;  %s1779_s12 = smov 0   ;;  %s1781_s13 = smov 0  }
   0x2   :  { %s1783_s14 = smov 0   ;;  %s1785_s15 = smov 0  }
   0x3 LB: > { %s1800_s16 = sadd.s32 4294967295, %s1747_s15   ;;  %s1573_s17 = sadd.s32 4294967294, %s1747_s15   ;;  %s1747_s15 = sphi %s1785_s15, %s1973_s15   ;;  %s1743_s14 = sphi %s1783_s14, %s1972_s14   ;;  %s1739_s13 = sphi %s1781_s13, %s1971_s13   ;;  %s1735_s12 = sphi %s1779_s12, %s1970_s12  }
   0x4   : > { %s1804_s18 = sadd.s32 1, %s1747_s15   ;;  %s91_s19 = sadd.s32 1, %s1743_s14 }
   0x5   : > { %s88_s20 = ssub.s32 %s1747_s15, %s1804_s18  ;;  %p101_p0 = scmp.ne.s32.totalorder %s1743_s14, %s1739_s13 }
   0x6   : > { %p89_p1 = scmp.eq.s32.totalorder %s88_s20, 0  ;;  %p102_p2 = scmp.eq.s32.totalorder %s1800_s16, 1 }
   0x7   : > { %p107_p3 = scmp.ne.s32.totalorder %s1739_s13, %s1735_s12  ;;  %p108_p4 = scmp.eq.s32.totalorder %s1573_s17, 1 }
   0x8   : > { %s1815_s21 = scalar_select %p89_p1, %s1743_s14, %s91_s19  }
   0x9   : > { %p1817_p5 = por %p102_p2, %p101_p0  ;;  %p1821_p6 = por %p108_p4, %p107_p3 }
   0xa   : > { %p1576_p7 = scmp.ge.s32.totalorder %s1747_s15, 1  ;;  %p141_p8 = scmp.lt.s32.totalorder %s1747_s15, 3 }
   0xc   : > { %p142_p9 = pnand %p1576_p7, %p141_p8 }
   0xd   : > { %s1578_s24 = sshll.u32 (!%p142_p9), %s1800_s16, 2  ;;  %v1749_v0 = vmov (!%p142_p9), 0.0   ;;  %s1750_s29 = smov (!%p142_p9), 127   ;;  %vm183_vm0 = vcmask (!%p142_p9), 1043456   ;;  %v172_v5 = vld [vmem:[%s1965_s1] sm:$0xf] (!%p142_p9) }
   0xe   : > { %145 = sbr.rel (%p142_p9) target bundleno = 441 (0x1b9), region = 32  ;;  %p166_p10 = scmp.lt.s32.totalorder (!%p142_p9), %s1578_s24, 7  ;;  %256 = vmatprep.mubr.f32.mxu0 (!%p142_p9), %v1749_v0  ;;  %327 = vmatprep.mubr.f32.mxu1 (!%p142_p9), %v1749_v0  ;;  %vm179_vm1 = vcmask (!%p142_p9), 31744   ;;  %v1755_v6 = vmov (!%p142_p9), 0   ;;  %v1480_v7 = vld [vmem:[%s1966_s2] sm:$0xf] (!%p142_p9) }
   0xf   : > { %s1751_s5 = smov (!%p142_p9), 126   ;;  %s1752_s6 = smov (!%p142_p9), 125   ;;  %1682 = vset.pattern.permute.xlu0 (!%p142_p9), %v1755_v6  ;;  %vm360_vm2 = vcmask (!%p142_p9), 1039360   ;;  %v1586_v12 = vld [vmem:[%s1965_s1 + $0x4] sm:$0xf] (!%p142_p9)  ;;  %vm549_vm3 = vcmask (!%p142_p9), 1031168  }
  0x10   : > { %s1753_s7 = smov (!%p142_p9), 124   ;;  %s1754_s8 = smov (!%p142_p9), 123   ;;  %v1593_v20 = vld [vmem:[%s1965_s1 + $0x8] sm:$0xf] (!%p142_p9)  ;;  %vm738_vm4 = vcmask (!%p142_p9), 1022976   ;;  %vm927_vm5 = vcmask (!%p142_p9), 1014784  }
  0x11   : > { %s1756_s9 = smov (!%p142_p9), 122   ;;  %v1600_v28 = vld [vmem:[%s1965_s1 + $0xc] sm:$0xf] (!%p142_p9)  ;;  %v1607_v36 = vld [vmem:[%s1965_s1 + $0x10] sm:$0xf] (!%p142_p9)  ;;  %vm1116_vm6 = vcmask (!%p142_p9), 1006592  }
  0x12   : > { %v1614_v44 = vld [vmem:[%s1965_s1 + $0x14] sm:$0xf] (!%p142_p9)  ;;  %vm1305_vm7 = vcmask (!%p142_p9), 998400   ;;  %v1621_v54 = vld [vmem:[%s1965_s1 + $0x18] sm:$0xf] (!%p142_p9)  ;;  %vm530_vm8 = vcmask (!%p142_p9), 1039364  }
  0x13   : > { %vm531_vm9 = vmor (!%p142_p9), %vm530_vm8, %vm183_vm0  ;;  %vm719_vm10 = vcmask (!%p142_p9), 1031172   ;;  %vm908_vm12 = vcmask (!%p142_p9), 1022980   ;;  %vm1097_vm14 = vcmask (!%p142_p9), 1014788  }
  0x14   : > { %vm720_vm11 = vmor (!%p142_p9), %vm719_vm10, %vm183_vm0 }
  0x15   : > { %s1975_s24 = smov (!%p166_p10, %s1578_s24), 7  ;;  %vm909_vm13 = vmor %vm908_vm12, %vm183_vm0 }
  0x16   : > { %s1579_s25 = sshll.u32 %s1975_s24, 2  ;;  %vm1098_vm15 = vmor %vm1097_vm14, %vm183_vm0 }
  0x17   : > { %s169_s28 = scalar_lea.vmem %s1964_s0, %s1579_s25 }
  0x18   : > { %v346_v1 = vld [vmem:[%s169_s28] sm:$0xff]  ;;  %v347_v2 = vld [vmem:[%s169_s28 + $0x8] sm:$0xff] }
  0x19   : > { %352 = vrot.lane.b32.xlu1 %v346_v1, %s1750_s29  ;;  %v350_v3 = vcombine.high %v346_v1, %v346_v1  ;;  %v351_v4 = vcombine.high %v347_v2, %v347_v2 }
  0x1b   : > { %354 = vrot.lane.b32.xlu0 %v350_v3, %s1750_s29  ;;  %1580 = vmatprep.subr.msk.mxu0 %vm183_vm0, %v350_v3 }
  0x1c   : > { %1583 = vmatprep.subr.msk.mxu1 %vm183_vm0, %v351_v4  ;;  %1581 = vmatpush1.msk.msra.mxu0 %vm183_vm0, %v346_v1 }
  0x1d   : > { %358 = vrot.lane.b32.xlu1 %v351_v4, %s1750_s29  ;;  %1584 = vmatpush1.msk.msra.mxu1 %vm183_vm0, %v347_v2 }
  0x1e   : > { %1582 = vmatmul.mubr.msk.f32.vlgmr.msra.gmra.mrb[0].mxu0 %vm179_vm1, %v172_v5  ;;  %1585 = vmatmul.mubr.msk.f32.vlgmr.msra.gmra.mrb[0].mxu1 %vm179_vm1, %v172_v5 }
  0x1f   : > { %356 = vrot.lane.b32.xlu0 %v347_v2, %s1750_s29  ;;  %439 = vmatprep.mubr.f32.mxu0 %v1749_v0 }
  0x20   : > { %510 = vmatprep.mubr.f32.mxu1 %v1749_v0 }
  0x21   : > { %545 = vrot.lane.b32.xlu1 %v347_v2, %s1751_s5 }
  0x23   : > { %543 = vrot.lane.b32.xlu0 %v350_v3, %s1751_s5 }
  0x25   : > { %547 = vrot.lane.b32.xlu1 %v351_v4, %s1751_s5 }
  0x27   : > { %541 = vrot.lane.b32.xlu0 %v346_v1, %s1751_s5 }
  0x29   : > { %734 = vrot.lane.b32.xlu1 %v347_v2, %s1752_s6 }
  0x2b   : > { %732 = vrot.lane.b32.xlu0 %v350_v3, %s1752_s6 }
  0x2d   : > { %736 = vrot.lane.b32.xlu1 %v351_v4, %s1752_s6 }
  0x2f   : > { %730 = vrot.lane.b32.xlu0 %v346_v1, %s1752_s6  ;;  %s162_s6 = sand.u32 1, %s1739_s13  }
  0x30   : > { %s1500_s20 = scalar_lea.sflag [#allocation4], %s162_s6 }
  0x31   : > { %923 = vrot.lane.b32.xlu1 %v347_v2, %s1753_s7 }
  0x33   : > { %921 = vrot.lane.b32.xlu0 %v350_v3, %s1753_s7 }
  0x35   : > { %925 = vrot.lane.b32.xlu1 %v351_v4, %s1753_s7 }
  0x37   : > { %919 = vrot.lane.b32.xlu0 %v346_v1, %s1753_s7  ;;  %s1577_s7 = sshll.u32 %s162_s6, 4 }
  0x39   : > { %1112 = vrot.lane.b32.xlu1 %v347_v2, %s1754_s8 }
  0x3b   : > { %1110 = vrot.lane.b32.xlu0 %v350_v3, %s1754_s8 }
  0x3d   : > { %1114 = vrot.lane.b32.xlu1 %v351_v4, %s1754_s8 }
  0x3f   : > { %1108 = vrot.lane.b32.xlu0 %v346_v1, %s1754_s8  ;;  %s164_s8 = scalar_lea.vmem [#allocation3], %s1577_s7 }
  0x40   : > { %s1514_s10 = sshll.u32 %s164_s8, 4  ;;  %s1924_s10 = int_to_ptr.vmem [resolvable:$true] %s1514_s10 }
  0x41   : > { %1301 = vrot.lane.b32.xlu1 %v347_v2, %s1756_s9  ;;  %s1685_s24 = scalar_lea.vmem %s1924_s10, 256 }
  0x42   : > { %p1686_p11 = scmp.ne.s32.totalorder %s1924_s10, %s1685_s24 }
  0x43   : > { %1299 = vrot.lane.b32.xlu0 %v350_v3, %s1756_s9 }
  0x44   : > { %p1687_p12 = pnand %p1686_p11, %p1817_p5 }
  0x45   : > { %1303 = vrot.lane.b32.xlu1 %v351_v4, %s1756_s9 }
  0x46   : > { %p1688_p13 = pneg %p1687_p12 }
  0x47   : > { %1297 = vrot.lane.b32.xlu0 %v346_v1, %s1756_s9  ;;  %s1633_s9 = sshll.u32 %s1800_s16, 8  ;;  %s1758_s16 = smov [#allocation3]  }
  0x48   : > { %s1922_s19 = scalar_lea.hbm %s1967_s3, %s1633_s9  ;;  %s1689_s25 = sshll.u32 %s1758_s16, 4  ;;  %s1690_s25 = int_to_ptr.vmem [resolvable:$false] %s1689_s25 }
  0x49   : > { %s1691_s26 = scalar_lea.vmem %s1690_s25, 512  ;;  %p1692_p0 = scmp.lt.s32.totalorder %s1924_s10, %s1690_s25 }
  0x4a   : > { %p1693_p1 = scmp.lt.s32.totalorder %s1691_s26, %s1685_s24 }
  0x4b   : > { %1483 = vperm.xlu0 %1682, %v1480_v7  }
  0x4c   : > { %p1694_p2 = por %p1693_p1, %p1692_p0 }
  0x4e   : > { %p1695_p3 = pnand %p1694_p2, %p1688_p13 }
  0x8b   : > { %v353_v8 = vpop.permute.xlu1 %352 }
  0x8d   : > { %v355_v9 = vpop.permute.xlu0 %354 }
  0x8e   : > { %v361_v15 = vsel %vm360_vm2, %v353_v8, %v355_v9 }
  0x8f   : > { %v359_v10 = vpop.permute.xlu1 %358 }
  0x90   : > { %1590 = vmatprep.subr.msk.mxu1 %vm183_vm0, %v359_v10 }
  0x91   : > { %v357_v11 = vpop.permute.xlu0 %356 }
  0x92   : > { %v362_v13 = vsel %vm360_vm2, %v355_v9, %v357_v11  ;;  %v363_v14 = vsel %vm360_vm2, %v357_v11, %v359_v10 }
  0x93   : > { %1587 = vmatprep.subr.msk.mxu0 %vm183_vm0, %v362_v13  ;;  %1591 = vmatpush1.msk.msra.mxu1 %vm183_vm0, %v363_v14  ;;  %v546_v16 = vpop.permute.xlu1 %545 }
  0x94   : > { %1588 = vmatpush1.msk.msra.mxu0 %vm183_vm0, %v361_v15  ;;  %1592 = vmatmul.mubr.msk.f32.vlgmr.msra.gmra.mrb[2].mxu1 %vm179_vm1, %v1586_v12 }
  0x95   : > { %v544_v17 = vpop.permute.xlu0 %543  ;;  %1589 = vmatmul.mubr.msk.f32.vlgmr.msra.gmra.mrb[2].mxu0 %vm179_vm1, %v1586_v12  ;;  %699 = vmatprep.mubr.f32.mxu1 %v1749_v0 }
  0x96   : > { %v551_v18 = vsel %vm549_vm3, %v544_v17, %v546_v16  ;;  %628 = vmatprep.mubr.f32.mxu0 %v1749_v0 }
  0x97   : > { %v548_v19 = vpop.permute.xlu1 %547  ;;  %1594 = vmatprep.subr.msk.mxu0 %vm183_vm0, %v551_v18 }
  0x98   : > { %v552_v21 = vsel %vm549_vm3, %v546_v16, %v548_v19  ;;  %1597 = vmatprep.subr.msk.mxu1 %vm183_vm0, %v548_v19 }
  0x99   : > { %v542_v22 = vpop.permute.xlu0 %541  ;;  %1598 = vmatpush1.msk.msra.mxu1 %vm183_vm0, %v552_v21 }
  0x9a   : > { %v550_v23 = vsel %vm549_vm3, %v542_v22, %v544_v17  ;;  %1599 = vmatmul.mubr.msk.f32.vlgmr.msra.gmra.mrb[4].mxu1 %vm179_vm1, %v1593_v20  ;;  %vm1475_vm3 = vcmask 998404  }
  0x9b   : > { %1595 = vmatpush1.msk.msra.mxu0 %vm183_vm0, %v550_v23  ;;  %v735_v24 = vpop.permute.xlu1 %734  ;;  %888 = vmatprep.mubr.f32.mxu1 %v1749_v0 }
  0x9c   : > { %1596 = vmatmul.mubr.msk.f32.vlgmr.msra.gmra.mrb[4].mxu0 %vm179_vm1, %v1593_v20 }
  0x9d   : > { %v733_v25 = vpop.permute.xlu0 %732  ;;  %817 = vmatprep.mubr.f32.mxu0 %v1749_v0 }
  0x9e   : > { %v740_v26 = vsel %vm738_vm4, %v733_v25, %v735_v24 }
  0x9f   : > { %v737_v27 = vpop.permute.xlu1 %736  ;;  %1601 = vmatprep.subr.msk.mxu0 %vm183_vm0, %v740_v26 }
  0xa0   : > { %v741_v29 = vsel %vm738_vm4, %v735_v24, %v737_v27  ;;  %1604 = vmatprep.subr.msk.mxu1 %vm183_vm0, %v737_v27 }
  0xa1   : > { %v731_v30 = vpop.permute.xlu0 %730  ;;  %1605 = vmatpush1.msk.msra.mxu1 %vm183_vm0, %v741_v29 }
  0xa2   : > { %v739_v31 = vsel %vm738_vm4, %v731_v30, %v733_v25  ;;  %1606 = vmatmul.mubr.msk.f32.vlgmr.msra.gmra.mrb[6].mxu1 %vm179_vm1, %v1600_v28  ;;  %vm1476_vm4 = vmor %vm1475_vm3, %vm183_vm0 }
  0xa3   : > { %1602 = vmatpush1.msk.msra.mxu0 %vm183_vm0, %v739_v31  ;;  %v924_v32 = vpop.permute.xlu1 %923  ;;  %1077 = vmatprep.mubr.f32.mxu1 %v1749_v0 }
  0xa4   : > { %1603 = vmatmul.mubr.msk.f32.vlgmr.msra.gmra.mrb[6].mxu0 %vm179_vm1, %v1600_v28 }
  0xa5   : > { %v922_v33 = vpop.permute.xlu0 %921  ;;  %1006 = vmatprep.mubr.f32.mxu0 %v1749_v0 }
  0xa6   : > { %v929_v34 = vsel %vm927_vm5, %v922_v33, %v924_v32 }
  0xa7   : > { %v926_v35 = vpop.permute.xlu1 %925  ;;  %1608 = vmatprep.subr.msk.mxu0 %vm183_vm0, %v929_v34  ;;  %v1488_v34 = vlaneseq }
  0xa8   : > { %v930_v37 = vsel %vm927_vm5, %v924_v32, %v926_v35  ;;  %1611 = vmatprep.subr.msk.mxu1 %vm183_vm0, %v926_v35  ;;  %v1757_v32 = vmov 839922192  }
  0xa9   : > { %v920_v38 = vpop.permute.xlu0 %919  ;;  %1612 = vmatpush1.msk.msra.mxu1 %vm183_vm0, %v930_v37 }
  0xaa   : > { %v928_v39 = vsel %vm927_vm5, %v920_v38, %v922_v33  ;;  %1613 = vmatmul.mubr.msk.f32.vlgmr.msra.gmra.mrb[8].mxu1 %vm179_vm1, %v1607_v36  ;;  %v1486_v33 = vunpack.c.l.s4 %v1757_v32 }
  0xab   : > { %1609 = vmatpush1.msk.msra.mxu0 %vm183_vm0, %v928_v39  ;;  %v1113_v40 = vpop.permute.xlu1 %1112  ;;  %1266 = vmatprep.mubr.f32.mxu1 %v1749_v0 }
  0xac   : > { %1610 = vmatmul.mubr.msk.f32.vlgmr.msra.gmra.mrb[8].mxu0 %vm179_vm1, %v1607_v36 }
  0xad   : > { %v1111_v41 = vpop.permute.xlu0 %1110  ;;  %1195 = vmatprep.mubr.f32.mxu0 %v1749_v0 }
  0xae   : > { %v1118_v42 = vsel %vm1116_vm6, %v1111_v41, %v1113_v40 }
  0xaf   : > { %v1115_v43 = vpop.permute.xlu1 %1114  ;;  %1615 = vmatprep.subr.msk.mxu0 %vm183_vm0, %v1118_v42  ;;  %v1487_v42 = vunpack.c.0.s8 %v1486_v33 }
  0xb0   : > { %v1119_v45 = vsel %vm1116_vm6, %v1113_v40, %v1115_v43  ;;  %1618 = vmatprep.subr.msk.mxu1 %vm183_vm0, %v1115_v43  ;;  %v1489_v43 = vshrl.u32 %v1488_v34, 7 }
  0xb1   : > { %v1109_v46 = vpop.permute.xlu0 %1108  ;;  %1619 = vmatpush1.msk.msra.mxu1 %vm183_vm0, %v1119_v45 }
  0xb2   : > { %v1117_v47 = vsel %vm1116_vm6, %v1109_v46, %v1111_v41  ;;  %1620 = vmatmul.mubr.msk.f32.vlgmr.msra.gmra.mrb[10].mxu1 %vm179_vm1, %v1614_v44  ;;  %v1490_v46 = vsub.s32 %v1487_v42, %v1489_v43 }
  0xb3   : > { %1616 = vmatpush1.msk.msra.mxu0 %vm183_vm0, %v1117_v47  ;;  %v1302_v48 = vpop.permute.xlu1 %1301  ;;  %1455 = vmatprep.mubr.f32.mxu1 %v1749_v0 }
  0xb4   : > { %1617 = vmatmul.mubr.msk.f32.vlgmr.msra.gmra.mrb[10].mxu0 %vm179_vm1, %v1614_v44 }
  0xb5   : > { %v1300_v49 = vpop.permute.xlu0 %1299  ;;  %1384 = vmatprep.mubr.f32.mxu0 %v1749_v0 }
  0xb6   : > { %v1307_v50 = vsel %vm1305_vm7, %v1300_v49, %v1302_v48 }
  0xb7   : > { %v1304_v51 = vpop.permute.xlu1 %1303  ;;  %1622 = vmatprep.subr.msk.mxu0 %vm183_vm0, %v1307_v50 }
  0xb8   : > { %v1308_v52 = vsel %vm1305_vm7, %v1302_v48, %v1304_v51  ;;  %1625 = vmatprep.subr.msk.mxu1 %vm183_vm0, %v1304_v51 }
  0xb9   : > { %v1298_v53 = vpop.permute.xlu0 %1297  ;;  %1626 = vmatpush1.msk.msra.mxu1 %vm183_vm0, %v1308_v52 }
  0xba   : > { %v1306_v55 = vsel %vm1305_vm7, %v1298_v53, %v1300_v49  ;;  %1627 = vmatmul.mubr.msk.f32.vlgmr.msra.gmra.mrb[12].mxu1 %vm179_vm1, %v1621_v54 }
  0xbb   : > { %1623 = vmatpush1.msk.msra.mxu0 %vm183_vm0, %v1306_v55 }
  0xbc   : > { %1624 = vmatmul.mubr.msk.f32.vlgmr.msra.gmra.mrb[12].mxu0 %vm179_vm1, %v1621_v54  ;;  %vm1286_vm1 = vcmask 1006596  }
  0xbd   : > { %vm1287_vm2 = vmor %vm1286_vm1, %vm183_vm0 }
  0xca   : > { %v1484_v48 = vpop.permute.xlu0 %1483 }
  0xcb   : > { %v1491_v53 = vrot.slane %v1484_v48, %v1490_v46 }
  0xf1   : > { %v258_v56 = vpop.f32.mrb[0].mxu0  ;;  %v329_v57 = vpop.f32.mrb[0].mxu1 }
  0xf2   : > { %v260_v58 = vpop.f32.mrb[1].mxu0  ;;  %v331_v59 = vpop.f32.mrb[1].mxu1 }
  0xf3   : > { %v338_v60 = vcombine.low %v258_v56, %v260_v58  ;;  %v339_v61 = vcombine.low %v329_v57, %v331_v59 }
  0xf5   : > { %343 = vst [vmem:[#allocation2 + $0x8] sm:$0xff] %v339_v61 }
 0x167   : > { %v512_v62 = vpop.f32.mrb[2].mxu1 }
 0x168   : > { %v441_v63 = vpop.f32.mrb[2].mxu0  ;;  %v514_v0 = vpop.f32.mrb[3].mxu1 }
 0x169   : > { %v443_v1 = vpop.f32.mrb[3].mxu0  ;;  %v524_v2 = vcombine.low %v512_v62, %v514_v0 }
 0x16a   : > { %v523_v3 = vcombine.low %v441_v63, %v443_v1 }
 0x16b   : > { %v528_v4 = vadd.f32 %v524_v2, %v339_v61 }
 0x16c   : > { %v527_v5 = vadd.f32 %v523_v3, %v338_v60 }
 0x16d   : > { %532 = vst.msk [vmem:[#allocation2 + $0x8] sm:$0xff] %vm531_vm9, %v528_v4  ;;  %v701_v6 = vpop.f32.mrb[4].mxu1 }
 0x16e   : > { %v703_v7 = vpop.f32.mrb[5].mxu1 }
 0x16f   : > { %v630_v8 = vpop.f32.mrb[4].mxu0  ;;  %v713_v9 = vcombine.low %v701_v6, %v703_v7 }
 0x170   : > { %v632_v10 = vpop.f32.mrb[5].mxu0 }
 0x171   : > { %v712_v11 = vcombine.low %v630_v8, %v632_v10 }
 0x173   : > { %v716_v12 = vadd.f32 %v712_v11, %v527_v5 }
 0x174   : > { %v707_v13 = vld [vmem:[#allocation2 + $0x8] sm:$0xff] }
 0x175   : > { %v717_v14 = vadd.f32 %v713_v9, %v707_v13  ;;  %v890_v15 = vpop.f32.mrb[6].mxu1 }
 0x176   : > { %v892_v16 = vpop.f32.mrb[7].mxu1 }
 0x177   : > { %721 = vst.msk [vmem:[#allocation2 + $0x8] sm:$0xff] %vm720_vm11, %v717_v14  ;;  %v819_v17 = vpop.f32.mrb[6].mxu0  ;;  %v902_v18 = vcombine.low %v890_v15, %v892_v16 }
 0x178   : > { %v821_v19 = vpop.f32.mrb[7].mxu0 }
 0x179   : > { %v901_v20 = vcombine.low %v819_v17, %v821_v19 }
 0x17b   : > { %v905_v21 = vadd.f32 %v901_v20, %v716_v12 }
 0x17d   : > { %v1079_v22 = vpop.f32.mrb[8].mxu1 }
 0x17e   : > { %v896_v23 = vld [vmem:[#allocation2 + $0x8] sm:$0xff]  ;;  %v1081_v24 = vpop.f32.mrb[9].mxu1 }
 0x17f   : > { %v906_v25 = vadd.f32 %v902_v18, %v896_v23  ;;  %v1008_v26 = vpop.f32.mrb[8].mxu0  ;;  %v1091_v27 = vcombine.low %v1079_v22, %v1081_v24 }
 0x180   : > { %v1010_v28 = vpop.f32.mrb[9].mxu0 }
 0x181   : > { %910 = vst.msk [vmem:[#allocation2 + $0x8] sm:$0xff] %vm909_vm13, %v906_v25  ;;  %v1090_v29 = vcombine.low %v1008_v26, %v1010_v28 }
 0x183   : > { %v1094_v30 = vadd.f32 %v1090_v29, %v905_v21 }
 0x185   : > { %v1268_v31 = vpop.f32.mrb[10].mxu1 }
 0x186   : > { %v1270_v35 = vpop.f32.mrb[11].mxu1 }
 0x187   : > { %v1197_v36 = vpop.f32.mrb[10].mxu0  ;;  %v1280_v37 = vcombine.low %v1268_v31, %v1270_v35 }
 0x188   : > { %v1085_v38 = vld [vmem:[#allocation2 + $0x8] sm:$0xff]  ;;  %v1199_v39 = vpop.f32.mrb[11].mxu0 }
 0x189   : > { %v1095_v40 = vadd.f32 %v1091_v27, %v1085_v38  ;;  %v1279_v41 = vcombine.low %v1197_v36, %v1199_v39 }
 0x18b   : > { %1099 = vst.msk [vmem:[#allocation2 + $0x8] sm:$0xff] %vm1098_vm15, %v1095_v40  ;;  %v1283_v44 = vadd.f32 %v1279_v41, %v1094_v30 }
 0x18d   : > { %v1457_v45 = vpop.f32.mrb[12].mxu1 }
 0x18e   : > { %v1459_v47 = vpop.f32.mrb[13].mxu1 }
 0x18f   : > { %v1386_v49 = vpop.f32.mrb[12].mxu0  ;;  %v1469_v50 = vcombine.low %v1457_v45, %v1459_v47 }
 0x190   : > { %v1388_v51 = vpop.f32.mrb[13].mxu0 }
 0x191   : > { %v1468_v52 = vcombine.low %v1386_v49, %v1388_v51 }
 0x192   : > { %v1274_v54 = vld [vmem:[#allocation2 + $0x8] sm:$0xff] }
 0x193   : > { %v1284_v55 = vadd.f32 %v1280_v37, %v1274_v54  ;;  %v1472_v56 = vadd.f32 %v1468_v52, %v1283_v44 }
 0x195   : > { %1288 = vst.msk [vmem:[#allocation2 + $0x8] sm:$0xff] %vm1287_vm2, %v1284_v55  ;;  %v1493_v57 = vadd.f32 %v1491_v53, %v1472_v56 }
 0x197   : > { %v1495_v58 = vmax.f32 %v1493_v57, 0.0 }
 0x199   : > { %1497 = vst [vmem:[%s164_s8] sm:$0xff] %v1495_v58 }
 0x19c   : > { %v1463_v59 = vld [vmem:[#allocation2 + $0x8] sm:$0xff] }
 0x19d   : > { %v1473_v60 = vadd.f32 %v1469_v50, %v1463_v59 }
 0x19f   : > { %1477 = vst.msk [vmem:[#allocation2 + $0x8] sm:$0xff] %vm1476_vm4, %v1473_v60 }
 0x1a6   : > { %v1479_v61 = vld [vmem:[#allocation2 + $0x8] sm:$0xff] }
 0x1a7   : > { %v1494_v62 = vadd.f32 %v1491_v53, %v1479_v61 }
 0x1a9   : > { %v1496_v63 = vmax.f32 %v1494_v62, 0.0 }
 0x1ab   : > { %1498 = vst [vmem:[%s164_s8 + $0x8] sm:$0xff] %v1496_v63 }
 0x1ac   : > { %1698 = shalt.err (!%p1695_p3)
}
 0x1ad   : > { %s1699_s27 = scalar_lea.hbm %s1922_s19, 256  ;;  %s1703_s30 = scalar_lea.hbm %s1967_s3, 512 }
 0x1ae   : > { %p1700_p4 = scmp.ne.s32.totalorder %s1922_s19, %s1699_s27  ;;  %p1704_p9 = scmp.lt.u32.totalorder %s1922_s19, %s1967_s3 }
 0x1af   : > { %p1705_p10 = scmp.lt.u32.totalorder %s1703_s30, %s1699_s27  ;;  %p1707_p12 = scmp.lt.u32.totalorder %s1699_s27, %s1922_s19 }
 0x1b0   : > { %p1701_p7 = pnand %p1700_p4, %p1817_p5 }
 0x1b1   : > { %p1706_p11 = por %p1705_p10, %p1704_p9 }
 0x1b2   : > { %p1702_p8 = pneg %p1701_p7 }
 0x1b3   : > { %p1708_p13 = por %p1707_p12, %p1706_p11 }
 0x1b5   : > { %p1709_p0 = pnand %p1708_p13, %p1702_p8 }
 0x1b7   : > { %1712 = shalt.err (!%p1709_p0)
}
 0x1b8   : > { %1634 = dma.vmem_to_hbm [thread:$0]  (%p1817_p5), %s1924_s10, 256, %s1922_s19, %s1500_s20  }
 0x1b9 PF: > { %p1640_p1 = scmp.ge.s32.totalorder %s1747_s15, 2  ;;  %s1526_s6 = sand.u32 1, %s1735_s12  }
 0x1ba   : > { %s1527_s7 = scalar_lea.sflag [#allocation4], %s1526_s6 }
 0x1bb   : > { %p1637_p2 = pnand %p1640_p1, %p1821_p6 }
 0x1bd   : > { %1730 = dma.done.wait (!%p1637_p2), %s1527_s7, 256  }
 0x1be   : > { %1732 = vsyncadd (!%p1637_p2), %s1527_s7, 4294967040  ;;  %p13_p3 = scmp.ge.s32.totalorder %s1804_s18, 4   ;;  %s1970_s12 = smov %s1739_s13 }
 0x1bf   : > { %s1971_s13 = smov %s1743_s14  ;;  %s1972_s14 = smov %s1815_s21 }
 0x1c0   : > { %s1973_s15 = smov %s1804_s18  ;;  %15 = sbr.rel (!%p13_p3) target bundleno = 3 (0x3), region = 73 }
 0x1c7   :  { %1532 = vsyncpa [#allocation4], 1 }
 0x1c8   :  { %1534 = vsyncpa [#allocation4 + $0x1], 1 }

</bundles_post_ra>
